<compile_context>
chip_gen: v7x
topology: tpu7x:2x2x1
jax: 0.10.0
libtpu: 0.0.40
codegen_flags: <defaults>
</compile_context>

<pallas_src>
import functools

import jax
import jax.numpy as jnp
from jax.experimental import pallas as pl
from jax.experimental.pallas import tpu as pltpu

_MIB = 1024 * 1024


def _interp_matrix(out_size: int, in_size: int) -> jnp.ndarray:
    """Row-interpolation matrix (f32) for 1-D linear resize, align_corners=True."""
    if out_size == 1:
        src = jnp.zeros((1,), dtype=jnp.float32)
    else:
        src = jnp.arange(out_size, dtype=jnp.float32) * (
            (in_size - 1) / (out_size - 1)
        )
    lo = jnp.clip(jnp.floor(src).astype(jnp.int32), 0, in_size - 1)
    hi = jnp.minimum(lo + 1, in_size - 1)
    frac = src - lo.astype(jnp.float32)
    rows = jnp.arange(out_size)
    w = jnp.zeros((out_size, in_size), dtype=jnp.float32)
    w = w.at[rows, lo].add(1.0 - frac)
    w = w.at[rows, hi].add(frac)
    return w


def _vmem_config():
    """Generation-aware (tiling budget, vmem_limit_bytes)."""
    try:
        cap = getattr(pltpu.get_tpu_info(), "vmem_capacity_bytes", 128 * _MIB)
    except Exception:  # e.g. interpret mode / no TPU visible at trace time
        cap = 128 * _MIB
    # v5e/v6e (128 MiB VMEM): limit 96 MiB, budget ~60 MiB.
    # v7x    (64 MiB VMEM):  limit 48 MiB, budget ~30 MiB.
    vmem_limit = min((cap * 3) // 4, 96 * _MIB)
    budget = (vmem_limit * 5) // 8
    return budget, vmem_limit


def _choose_block(nc, aligned, fits):
    """Largest legal (n,c)-slab block under the VMEM budget.

    Preference: even grid length (keeps both v7x TensorCores busy every step),
    then grid length >= 2 (pipelining), then the largest block (bigger DMAs,
    fewer ~0.35us grid steps, bigger matmul M).  No artificial size cap.
    """
    candidates = [d for d in range(1, nc + 1)
                  if nc % d == 0 and aligned(d) and fits(d)]
    if not candidates:
        # Correctness fallback: the SMALLEST alignment-legal divisor (minimum
        # VMEM pressure).  b == nc is always alignment-legal, so never empty.
        return min(d for d in range(1, nc + 1) if nc % d == 0 and aligned(d))
    return max(candidates,
               key=lambda d: ((nc // d) % 2 == 0 and (nc // d) >= 2,
                              (nc // d) >= 2,
                              d))


# --------------------------------------------------------------------------
# Fused path: one lane-dense MXU matmul per grid step.
# --------------------------------------------------------------------------
def _fused_kernel(x_ref, w_ref, o_ref):
    # x_ref: (B, H_in*W_in)   flattened input slabs (lane-dense rows)
    # w_ref: (H_in*W_in, H_out*W_out)  kron(Wh, Ww)^T, constant
    # o_ref: (B, H_out*W_out) flattened output slabs (lane-dense rows)
    o_ref[...] = jnp.dot(
        x_ref[...], w_ref[...], preferred_element_type=jnp.float32
    ).astype(o_ref.dtype)


# --------------------------------------------------------------------------
# Separable fallback path (large spatial): width pass merged, height per-slab.
# --------------------------------------------------------------------------
def _separable_kernel(x_ref, wh_ref, wwt_ref, o_ref):
    # x_ref:   (B*H_in,  W_in)
    # wh_ref:  (H_out,   H_in)
    # wwt_ref: (W_in,    W_out)
    # o_ref:   (B*H_out, W_out)
    h_out, h_in = wh_ref.shape
    b = x_ref.shape[0] // h_in

    # Width pass: ONE merged MXU matmul over all B slabs (M = B*H_in).
    tmp = jnp.dot(x_ref[...], wwt_ref[...],
                  preferred_element_type=jnp.float32)          # (B*H_in, W_out)
    tmp = tmp.astype(wh_ref.dtype)

    wh = wh_ref[...]
    # Height pass: per-slab matmul.  Only used when H_out is large (fused path
    # handles small spatial), so M = H_out fills the MXU adequately.
    for i in range(b):
        slab = tmp[i * h_in:(i + 1) * h_in, :]                 # (H_in, W_out)
        o_ref[i * h_out:(i + 1) * h_out, :] = jnp.dot(
            wh, slab, preferred_element_type=jnp.float32
        ).astype(o_ref.dtype)


@functools.partial(jax.jit, static_argnames=("downsample_scale", "target_shape"))
def downsample2d(x, *, downsample_scale=None, target_shape=None):
    """Equivalent of DownSample2D(mode='bilinear').forward(x, target_shape)."""
    n, c, h_in, w_in = x.shape
    if target_shape is None:
        target_shape = (h_in // downsample_scale, w_in // downsample_scale)
    h_out, w_out = target_shape
    nc = n * c
    out_dtype = x.dtype

    # bf16 weights for bf16 inputs -> fast MXU path; accumulation stays f32.
    w_dtype = jnp.bfloat16 if x.dtype == jnp.bfloat16 else jnp.float32
    w_isz = jnp.dtype(w_dtype).itemsize
    x_isz = x.dtype.itemsize

    wh = _interp_matrix(h_out, h_in)   # (H_out, H_in), f32
    ww = _interp_matrix(w_out, w_in)   # (W_out, W_in), f32

    budget, vmem_limit = _vmem_config()

    k_in = h_in * w_in
    k_out = h_out * w_out
    fused_weight_bytes = k_in * k_out * w_isz

    # ------------------------------------------------------------------
    # Path 1: small spatial -> fold both passes into one kron-weight matmul.
    # ------------------------------------------------------------------
    if fused_weight_bytes <= min(budget // 4, 8 * _MIB):
        # W2[h*W_in + w, o*W_out + p] = Wh[o, h] * Ww[p, w]
        w2 = jnp.einsum("oh,pw->hwop", wh, ww).reshape(k_in, k_out).astype(w_dtype)

        def fits(b):
            per_step = (2 * b * k_in * x_isz       # input block, double-buffered
                        + 2 * b * k_out * x_isz    # output block, double-buffered
                        + b * k_out * 4)           # f32 matmul result before cast
            return per_step + fused_weight_bytes <= budget

        def aligned(b):
            return b % 8 == 0 or b == nc

        b = _choose_block(nc, aligned, fits)
        grid = (nc // b,)
        x2 = x.reshape(nc, k_in)                   # free row-major reshape

        out2 = pl.pallas_call(
            _fused_kernel,
            out_shape=jax.ShapeDtypeStruct((nc, k_out), out_dtype),
            grid_spec=pltpu.PrefetchScalarGridSpec(
                num_scalar_prefetch=0,
                grid=grid,
                in_specs=[
                    pl.BlockSpec((b, k_in), lambda g: (g, 0)),
                    # constant weight: block index never changes -> single-buffer
                    pl.BlockSpec((k_in, k_out), lambda g: (0, 0),
                                 pipeline_mode=pl.Buffered(1)),
                ],
                out_specs=pl.BlockSpec((b, k_out), lambda g: (g, 0)),
            ),
            compiler_params=pltpu.CompilerParams(
                dimension_semantics=("parallel",),
                vmem_limit_bytes=vmem_limit,
            ),
            cost_estimate=pl.CostEstimate(
                flops=2 * nc * k_in * k_out,
                transcendentals=0,
                bytes_accessed=nc * (k_in + k_out) * x_isz + fused_weight_bytes,
            ),
        )(x2, w2)
        return out2.reshape(n, c, h_out, w_out)

    # ------------------------------------------------------------------
    # Path 2: large spatial -> separable two-matmul path.
    # ------------------------------------------------------------------
    wh_w = wh.astype(w_dtype)          # (H_out, H_in)
    wwt = ww.astype(w_dtype).T         # (W_in,  W_out)
    sep_weight_bytes = (h_out * h_in + w_in * w_out) * w_isz

    def fits(b):
        per_step = (2 * b * h_in * w_in * x_isz      # input, double-buffered
                    + 2 * b * h_out * w_out * x_isz  # output, double-buffered
                    + b * h_in * w_out * 4           # f32 width-pass intermediate
                    + b * h_out * w_out * 4)         # f32 height-pass result
        return per_step + sep_weight_bytes <= budget

    def aligned(b):
        ok_in = (b * h_in) % 8 == 0 or b == nc
        ok_out = (b * h_out) % 8 == 0 or b == nc
        return ok_in and ok_out

    b = _choose_block(nc, aligned, fits)
    grid = (nc // b,)
    x2 = x.reshape(nc * h_in, w_in)                # free row-major reshape

    out2 = pl.pallas_call(
        _separable_kernel,
        out_shape=jax.ShapeDtypeStruct((nc * h_out, w_out), out_dtype),
        grid_spec=pltpu.PrefetchScalarGridSpec(
            num_scalar_prefetch=0,
            grid=grid,
            in_specs=[
                pl.BlockSpec((b * h_in, w_in), lambda g: (g, 0)),
                pl.BlockSpec((h_out, h_in), lambda g: (0, 0),
                             pipeline_mode=pl.Buffered(1)),
                pl.BlockSpec((w_in, w_out), lambda g: (0, 0),
                             pipeline_mode=pl.Buffered(1)),
            ],
            out_specs=pl.BlockSpec((b * h_out, w_out), lambda g: (g, 0)),
        ),
        compiler_params=pltpu.CompilerParams(
            dimension_semantics=("parallel",),
            vmem_limit_bytes=vmem_limit,
        ),
        cost_estimate=pl.CostEstimate(
            flops=2 * nc * (h_in * w_in * w_out + h_out * h_in * w_out),
            transcendentals=0,
            bytes_accessed=nc * (h_in * w_in + h_out * w_out) * x_isz
                           + sep_weight_bytes,
        ),
    )(x2, wh_w, wwt)
    return out2.reshape(n, c, h_out, w_out)


def _reference(x, downsample_scale):
    """Pure-JAX reference: separable align_corners=True bilinear, f32 weights."""
    n, c, h_in, w_in = x.shape
    h_out, w_out = h_in // downsample_scale, w_in // downsample_scale
    wh = _interp_matrix(h_out, h_in)
    ww = _interp_matrix(w_out, w_in)
    return jnp.einsum("oh,nchw,pw->ncop", wh, x.astype(jnp.float32), ww)


if __name__ == "__main__":
    key = jax.random.PRNGKey(0)
    scale = 2  # downsample_scale; mode = "bilinear", align_corners=True

    # --- f32, small spatial (fused kron path) ---
    x = jax.random.normal(key, (2, 4, 16, 16), dtype=jnp.float32)
    out = jax.block_until_ready(downsample2d(x, downsample_scale=scale))
    ref = _reference(x, scale)
    assert out.shape == (2, 4, 8, 8), out.shape
    err = float(jnp.max(jnp.abs(out.astype(jnp.float32) - ref)))
    assert err < 1e-5, err

    # --- bf16, small spatial (bf16 MXU path; looser tolerance) ---
    xb = x.astype(jnp.bfloat16)
    outb = jax.block_until_ready(downsample2d(xb, downsample_scale=scale))
    errb = float(jnp.max(jnp.abs(outb.astype(jnp.float32) - _reference(xb, scale))))
    assert errb < 1e-1, errb

    # --- f32, larger spatial (separable fallback path) ---
    x3 = jax.random.normal(key, (1, 8, 64, 64), dtype=jnp.float32)
    out3 = jax.block_until_ready(downsample2d(x3, downsample_scale=scale))
    ref3 = _reference(x3, scale)
    assert out3.shape == (1, 8, 32, 32), out3.shape
    err3 = float(jnp.max(jnp.abs(out3.astype(jnp.float32) - ref3)))
    assert err3 < 1e-5, err3

    print("KERNEL_OK")
</pallas_src>

<mosaic_0001>
module attributes {stable_mosaic.version = 11 : i64} {
  func.func @_fused_kernel(%arg0: i32, %arg1: memref<8x256xf32, #tpu.memory_space<vmem>>, %arg2: memref<256x64xf32, #tpu.memory_space<vmem>>, %arg3: memref<8x64xf32, #tpu.memory_space<vmem>>) attributes {dimension_semantics = [#tpu.dimension_semantics<parallel>], iteration_bounds = array<i64: 1>, scalar_prefetch = 0 : i64, scratch_operands = 0 : i64, tpu.core_type = #tpu.core_type<tc>, window_params = [{transform_indices = @transform_0, window_bounds = array<i64: 8, 256>}, {pipeline_mode = #tpu.pipeline_mode<synchronous>, transform_indices = @transform_1, window_bounds = array<i64: 256, 64>}, {transform_indices = @transform_2, window_bounds = array<i64: 8, 64>}]} {
    %c0 = arith.constant 0 : index
    %c0_0 = arith.constant 0 : index
    %0 = vector.load %arg1[%c0, %c0_0] : memref<8x256xf32, #tpu.memory_space<vmem>>, vector<8x256xf32>
    %c0_1 = arith.constant 0 : index
    %c0_2 = arith.constant 0 : index
    %1 = vector.load %arg2[%c0_1, %c0_2] : memref<256x64xf32, #tpu.memory_space<vmem>>, vector<256x64xf32>
    %cst = arith.constant dense<0.000000e+00> : vector<8x64xf32>
    %2 = tpu.matmul %0, %1, %cst {dimension_numbers = #tpu.dot_dimension_numbers<[1], [0], [0], [1], [0, 0, 1, 1], [], []>} : vector<8x256xf32>, vector<256x64xf32>, vector<8x64xf32> -> vector<8x64xf32>
    %c0_3 = arith.constant 0 : index
    %c0_4 = arith.constant 0 : index
    %3 = vector.load %arg3[%c0_3, %c0_4] : memref<8x64xf32, #tpu.memory_space<vmem>>, vector<8x64xf32>
    tpu.vector_store %arg3[%c0_3, %c0_4], %2 {strides = array<i32>} : memref<8x64xf32, #tpu.memory_space<vmem>>, vector<8x64xf32>,
    return
  }
  func.func @transform_0(%arg0: i32) -> (i32, i32) {
    %c0_i32 = arith.constant 0 : i32
    %c0_i32_0 = arith.constant 0 : i32
    return %arg0, %c0_i32 : i32, i32
  }
  func.func @transform_1(%arg0: i32) -> (i32, i32) {
    %c0_i32 = arith.constant 0 : i32
    %c0_i32_0 = arith.constant 0 : i32
    %c0_i32_1 = arith.constant 0 : i32
    return %c0_i32, %c0_i32_0 : i32, i32
  }
  func.func @transform_2(%arg0: i32) -> (i32, i32) {
    %c0_i32 = arith.constant 0 : i32
    %c0_i32_0 = arith.constant 0 : i32
    return %arg0, %c0_i32 : i32, i32
  }
}

</mosaic_0001>

<bundles_post_ra>
// kernel: downsample2d.1
= control target key start
LH: loop header
LB: loop body
LE: loop exit
PB: predicated region body
PF: predicated region fallthrough
CT: control target
= control target key end

     0   :  { %7 = vsyncpa [#allocation3], 0  ;;  %s367_s0 = inlined_call_operand.hbm [shape: f32[8,256], index: 0, kind: input, shape index: {}]   ;;  %s368_s1 = inlined_call_operand.hbm [shape: f32[256,64], index: 1, kind: input, shape index: {}]   ;;  %s369_s2 = inlined_call_operand.hbm [shape: f32[8,64], index: 2, kind: output, shape index: {}]  }
   0x1   :  { %8 = vsyncpa [#allocation6], 0 }
   0x2   :  { %9 = vsyncpa [#allocation4], 0  ;;  %s304_s9 = smov [#allocation2]   ;;  %s305_s11 = smov [#allocation5]  }
   0x3   :  { %s16_s10 = sshll.u32 %s304_s9, 4  ;;  %s25_s12 = sshll.u32 %s305_s11, 4  ;;  %s17_s10 = int_to_ptr.vmem [resolvable:$true] %s16_s10  ;;  %s324_s12 = int_to_ptr.vmem [resolvable:$true] %s25_s12 }
   0x4   :  { %s232_s15 = scalar_lea.hbm %s367_s0, 256 }
   0x5   :  { %p233_p0 = scmp.ne.s32.totalorder %s367_s0, %s232_s15  ;;  %p236_p1 = scmp.lt.u32.totalorder %s232_s15, %s367_s0 }
   0x7   :  { %p238_p2 = pnand %p236_p1, %p233_p0 }
   0x9   :  { %241 = shalt.err (!%p238_p2)
}
   0xa   :  { %s242_s20 = scalar_lea.vmem %s17_s10, 256  ;;  %p247_p4 = scmp.lt.s32.totalorder %s17_s10, %s17_s10 }
   0xb   :  { %p243_p3 = scmp.ne.s32.totalorder %s17_s10, %s242_s20  ;;  %p248_p5 = scmp.lt.s32.totalorder %s242_s20, %s242_s20 }
   0xd   :  { %p249_p6 = por %p248_p5, %p247_p4 }
   0xf   :  { %p250_p7 = pnand %p249_p6, %p243_p3 }
  0x11   :  { %253 = shalt.err (!%p250_p7)
}
  0x12   :  { %19 = dma.hbm_to_vmem [thread:$0]  %s367_s0, 256, %s17_s10, [#allocation3]  }
  0x13   :  { %s254_s25 = scalar_lea.hbm %s368_s1, 4096 }
  0x14   :  { %p255_p8 = scmp.ne.s32.totalorder %s368_s1, %s254_s25  ;;  %p258_p9 = scmp.lt.u32.totalorder %s254_s25, %s368_s1 }
  0x16   :  { %p260_p10 = pnand %p258_p9, %p255_p8 }
  0x18   :  { %263 = shalt.err (!%p260_p10)
}
  0x19   :  { %s264_s30 = scalar_lea.vmem %s324_s12, 4096  ;;  %p269_p12 = scmp.lt.s32.totalorder %s324_s12, %s324_s12 }
  0x1a   :  { %p265_p11 = scmp.ne.s32.totalorder %s324_s12, %s264_s30  ;;  %p270_p13 = scmp.lt.s32.totalorder %s264_s30, %s264_s30 }
  0x1c   :  { %p271_p0 = por %p270_p13, %p269_p12 }
  0x1e   :  { %p272_p1 = pnand %p271_p0, %p265_p11 }
  0x20   :  { %275 = shalt.err (!%p272_p1)
}
  0x21   :  { %s306_s0 = smov 128   ;;  %s307_s3 = smov 8  }
  0x22   :  { %31 = dma.hbm_to_vmem [thread:$0]  %s368_s1, 4096, %s324_s12, [#allocation6], %s306_s0, %s306_s0, %s307_s3  }
  0x23   :  { %298 = dma.done.wait [#allocation3], 256  }
  0x24   :  { %299 = vsyncadd [#allocation3], 4294967040 }
  0x25   :  { %300 = dma.done.wait [#allocation6], 4096  }
  0x26   :  { %301 = vsyncadd [#allocation6], 4294963200  ;;  %v56_v0 = vld [vmem:[#allocation5 + $0x80] sm:$0xff]  ;;  %v57_v1 = vld [vmem:[#allocation5 + $0x88] sm:$0xff]  ;;  %s308_s1 = smov [#allocation7]   ;;  %vm142_vm0 = vcmask 523264  }
  0x27   :  { %v40_v2 = vld [vmem:[#allocation5] sm:$0xff]  ;;  %v195_v3 = vpack.c.bf16 %v57_v1, %v56_v0  ;;  %v41_v4 = vld [vmem:[#allocation5 + $0x8] sm:$0xff]  ;;  %v58_v5 = vld [vmem:[#allocation5 + $0x90] sm:$0xff]  ;;  %s150_s6 = sshll.u32 %s308_s1, 4  ;;  %s151_s6 = int_to_ptr.vmem [resolvable:$true] %s150_s6 }
  0x28   :  { %v59_v6 = vld [vmem:[#allocation5 + $0x98] sm:$0xff]  ;;  %v197_v7 = vpack.c.bf16 %v41_v4, %v40_v2  ;;  %v42_v9 = vld [vmem:[#allocation5 + $0x10] sm:$0xff]  ;;  %v60_v11 = vld [vmem:[#allocation5 + $0xa0] sm:$0xff]  ;;  %s276_s7 = scalar_lea.vmem %s151_s6, 128  ;;  %p281_p3 = scmp.lt.s32.totalorder %s151_s6, %s151_s6 }
  0x29   :  { %v199_v8 = vpack.c.bf16 %v59_v6, %v58_v5  ;;  %v43_v10 = vld [vmem:[#allocation5 + $0x18] sm:$0xff]  ;;  %196 = vmatprep.subr.bf16.mxu0 %v195_v3  ;;  %v61_v12 = vld [vmem:[#allocation5 + $0xa8] sm:$0xff]  ;;  %v44_v15 = vld [vmem:[#allocation5 + $0x20] sm:$0xff]  ;;  %p277_p2 = scmp.ne.s32.totalorder %s151_s6, %s276_s7  ;;  %p282_p4 = scmp.lt.s32.totalorder %s276_s7, %s276_s7 }
  0x2a   :  { %198 = vmatpush3.bf16.msra.mxu0 %v197_v7  ;;  %v201_v13 = vpack.c.bf16 %v43_v10, %v42_v9  ;;  %v203_v14 = vpack.c.bf16 %v61_v12, %v60_v11  ;;  %v45_v16 = vld [vmem:[#allocation5 + $0x28] sm:$0xff]  ;;  %v62_v17 = vld [vmem:[#allocation5 + $0xb0] sm:$0xff]  ;;  %v63_v18 = vld [vmem:[#allocation5 + $0xb8] sm:$0xff] }
  0x2b   :  { %200 = vmatprep.subr.bf16.mxu0 %v199_v8  ;;  %v205_v19 = vpack.c.bf16 %v45_v16, %v44_v15  ;;  %v207_v20 = vpack.c.bf16 %v63_v18, %v62_v17  ;;  %v46_v21 = vld [vmem:[#allocation5 + $0x30] sm:$0xff]  ;;  %v47_v22 = vld [vmem:[#allocation5 + $0x38] sm:$0xff]  ;;  %v64_v23 = vld [vmem:[#allocation5 + $0xc0] sm:$0xff]  ;;  %p283_p5 = por %p282_p4, %p281_p3 }
  0x2c   :  { %v65_v24 = vld [vmem:[#allocation5 + $0xc8] sm:$0xff]  ;;  %v39_v25 = vld [vmem:[#allocation2 + $0x8] sm:$0xff]  ;;  %v209_v26 = vpack.c.bf16 %v47_v22, %v46_v21  ;;  %v48_v28 = vld [vmem:[#allocation5 + $0x40] sm:$0xff] }
  0x2d   :  { %136 = vmatprep.mubr.f32.mxu0 %v39_v25  ;;  %v211_v27 = vpack.c.bf16 %v65_v24, %v64_v23  ;;  %v49_v29 = vld [vmem:[#allocation5 + $0x48] sm:$0xff]  ;;  %v66_v30 = vld [vmem:[#allocation5 + $0xd0] sm:$0xff]  ;;  %v67_v31 = vld [vmem:[#allocation5 + $0xd8] sm:$0xff]  ;;  %p284_p6 = pnand %p283_p5, %p277_p2 }
  0x2e   :  { %202 = vmatpush3.bf16.msra.mxu0 %v201_v13  ;;  %v213_v32 = vpack.c.bf16 %v49_v29, %v48_v28  ;;  %v215_v33 = vpack.c.bf16 %v67_v31, %v66_v30  ;;  %v50_v34 = vld [vmem:[#allocation5 + $0x50] sm:$0xff]  ;;  %v51_v35 = vld [vmem:[#allocation5 + $0x58] sm:$0xff]  ;;  %v68_v36 = vld [vmem:[#allocation5 + $0xe0] sm:$0xff] }
  0x2f   :  { %204 = vmatprep.subr.bf16.mxu0 %v203_v14  ;;  %v69_v37 = vld [vmem:[#allocation5 + $0xe8] sm:$0xff]  ;;  %v217_v38 = vpack.c.bf16 %v51_v35, %v50_v34  ;;  %v52_v40 = vld [vmem:[#allocation5 + $0x60] sm:$0xff]  ;;  %v70_v42 = vld [vmem:[#allocation5 + $0xf0] sm:$0xff] }
  0x30   :  { %v219_v39 = vpack.c.bf16 %v69_v37, %v68_v36  ;;  %v53_v41 = vld [vmem:[#allocation5 + $0x68] sm:$0xff]  ;;  %v71_v43 = vld [vmem:[#allocation5 + $0xf8] sm:$0xff]  ;;  %v54_v46 = vld [vmem:[#allocation5 + $0x70] sm:$0xff] }
  0x31   :  { %v221_v44 = vpack.c.bf16 %v53_v41, %v52_v40  ;;  %v223_v45 = vpack.c.bf16 %v71_v43, %v70_v42  ;;  %v55_v47 = vld [vmem:[#allocation5 + $0x78] sm:$0xff]  ;;  %v38_v49 = vld [vmem:[#allocation2] sm:$0xff] }
  0x32   :  { %206 = vmatpush3.bf16.msra.mxu0 %v205_v19  ;;  %v225_v48 = vpack.c.bf16 %v55_v47, %v54_v46 }
  0x33   :  { %208 = vmatprep.subr.bf16.mxu0 %v207_v20 }
  0x36   :  { %210 = vmatpush3.bf16.msra.mxu0 %v209_v26 }
  0x37   :  { %212 = vmatprep.subr.bf16.mxu0 %v211_v27 }
  0x3a   :  { %214 = vmatpush3.bf16.msra.mxu0 %v213_v32 }
  0x3b   :  { %216 = vmatprep.subr.bf16.mxu0 %v215_v33 }
  0x3e   :  { %218 = vmatpush3.bf16.msra.mxu0 %v217_v38 }
  0x3f   :  { %220 = vmatprep.subr.bf16.mxu0 %v219_v39 }
  0x42   :  { %222 = vmatpush3.bf16.msra.mxu0 %v221_v44 }
  0x43   :  { %224 = vmatprep.subr.bf16.mxu0 %v223_v45 }
  0x46   :  { %226 = vmatpush3.bf16.msra.mxu0 %v225_v48 }
  0x49   :  { %137 = vmatmul.mubr.f32.vlgmr.msra.gmra.mrb[0].mxu0 %v38_v49 }
 0x11c   :  { %v192_v50 = vpop.f32.mrb[0].mxu0 }
 0x11d   :  { %v193_v51 = vpop.f32.mrb[1].mxu0 }
 0x11e   :  { %v194_v52 = vadd.f32 %v193_v51, %v192_v50 }
 0x120   :  { %143 = vst.msk [vmem:[#allocation7] sm:$0xff] %vm142_vm0, %v194_v52 }
 0x121   :  { %287 = shalt.err (!%p284_p6)
}
 0x122   :  { %s288_s10 = scalar_lea.hbm %s369_s2, 128 }
 0x123   :  { %p289_p7 = scmp.ne.s32.totalorder %s369_s2, %s288_s10  ;;  %p292_p8 = scmp.lt.u32.totalorder %s288_s10, %s369_s2 }
 0x125   :  { %p294_p9 = pnand %p292_p8, %p289_p7 }
 0x127   :  { %297 = shalt.err (!%p294_p9)
}
 0x128   :  { %153 = dma.vmem_to_hbm [thread:$0]  %s151_s6, 128, %s369_s2, [#allocation4]  }
 0x129   :  { %302 = dma.done.wait [#allocation4], 128  }
 0x12a   :  { %303 = vsyncadd [#allocation4], 4294967168 }
 0x12b   :  { %157 = vsyncpa [#allocation3], 1 }
 0x12c   :  { %158 = vsyncpa [#allocation6], 1 }
 0x12d   :  { %159 = vsyncpa [#allocation4], 1 }

</bundles_post_ra>
